<compile_context>
chip_gen: v7x
topology: tpu7x:2x2x1
jax: 0.10.0
libtpu: 0.0.40
codegen_flags: <defaults>
</compile_context>

<pallas_src>
import math
import functools

import jax
import jax.numpy as jnp
from jax import lax
from jax.experimental import pallas as pl
from jax.experimental.pallas import tpu as pltpu


# Scoped-VMEM ceiling: well above what the tiles below need (~12 MiB double
# buffered) and below v7x's 64 MiB physical VMEM (v5e/v6e have 128 MiB).
_VMEM_LIMIT = 48 * 1024 * 1024


# ----------------------------------------------------------------------------
# helpers
# ----------------------------------------------------------------------------
def _round_up(x, m):
    return ((x + m - 1) // m) * m


def _fit_sub_tile(n, pref):
    """Sublane-dim tile: pref rounded to a multiple of 8, or 8-rounded full dim."""
    pref = max(8, (pref // 8) * 8)
    return pref if n > pref else _round_up(n, 8)


def _fit_lane_tile(n, pref):
    """Lane-dim tile: multiple of 128 when tiling, or the full dim if it fits."""
    pref = max(128, (pref // 128) * 128)
    return pref if n > pref else n


def _tpu_generation():
    try:
        kind = jax.devices()[0].device_kind.lower()
    except Exception:
        return 0
    for g in (7, 6, 5, 4):
        if f"v{g}" in kind or f"tpu{g}" in kind:
            return g
    return 0


def _linear_tile_defaults():
    gen = _tpu_generation()
    if gen >= 7:
        # v7x: 64 MiB physical VMEM -> keep the K tile smaller.
        return 512, 512, 512
    # v5e / v6e (128 MiB VMEM): big K tile amortizes weight re-streaming.
    return 512, 512, 1024


def _attn_tile_defaults():
    gen = _tpu_generation()
    if gen == 5:
        # v5e: low HBM BW -> larger q tile halves K/V re-reads; tk=128 fills
        # the 128-wide MXU and keeps score-tile vreg pressure down.
        return 512, 128
    return 256, 256


# ----------------------------------------------------------------------------
# tiled linear (x @ w, no bias: to_q / to_k / to_v / fused QKV / fused KV)
# ----------------------------------------------------------------------------
def _matmul_kernel(x_ref, w_ref, o_ref, acc_ref):
    @pl.when(pl.program_id(2) == 0)
    def _():
        acc_ref[...] = jnp.zeros_like(acc_ref)

    acc_ref[...] += jnp.dot(x_ref[...], w_ref[...],
                            preferred_element_type=jnp.float32)

    @pl.when(pl.program_id(2) == pl.num_programs(2) - 1)
    def _():
        o_ref[...] = acc_ref[...].astype(o_ref.dtype)


def pallas_linear(x2d, w_t, *, tm=None, tn=None, tk=None):
    """x2d: (M, Din) @ w_t: (Din, Dout) -> (M, Dout)."""
    M, Din = x2d.shape
    Dout = w_t.shape[1]
    tm0, tn0, tk0 = _linear_tile_defaults()
    tm = _fit_sub_tile(M, tm or tm0)
    tn = _fit_lane_tile(Dout, tn or tn0)
    tk = _fit_lane_tile(Din, tk or tk0)

    # Ragged tails: zero-pad to tile multiples (exact for the contraction dim;
    # padded rows / cols are sliced off) instead of full-dim block fallback.
    Mp, Kp, Np = _round_up(M, tm), _round_up(Din, tk), _round_up(Dout, tn)
    if (Mp, Kp) != (M, Din):
        x2d = jnp.pad(x2d, ((0, Mp - M), (0, Kp - Din)))
    if (Kp, Np) != (Din, Dout):
        w_t = jnp.pad(w_t, ((0, Kp - Din), (0, Np - Dout)))

    out = pl.pallas_call(
        _matmul_kernel,
        out_shape=jax.ShapeDtypeStruct((Mp, Np), x2d.dtype),
        grid=(Mp // tm, Np // tn, Kp // tk),
        in_specs=[pl.BlockSpec((tm, tk), lambda i, j, k: (i, k)),
                  pl.BlockSpec((tk, tn), lambda i, j, k: (k, j))],
        out_specs=pl.BlockSpec((tm, tn), lambda i, j, k: (i, j)),
        scratch_shapes=[pltpu.VMEM((tm, tn), jnp.float32)],
        compiler_params=pltpu.CompilerParams(
            dimension_semantics=("parallel", "parallel", "arbitrary"),
            vmem_limit_bytes=_VMEM_LIMIT),
    )(x2d, w_t)
    if (Mp, Np) != (M, Dout):
        out = out[:M, :Dout]
    return out


# ----------------------------------------------------------------------------
# flash attention (online softmax over KV tiles) fused with the to_out proj
# ----------------------------------------------------------------------------
def _flash_attn_out_kernel(q_ref, k_ref, v_ref, wo_ref, bo_ref, o_ref,
                           q_sc, m_ref, l_ref, acc_ref,
                           *, heads, dim_head, kv_tile, kv_valid):
    ki = pl.program_id(2)
    nt_dims = (((1,), (1,)), ((), ()))   # contract last dims of both operands

    @pl.when(ki == 0)
    def _():
        m_ref[...] = jnp.full_like(m_ref, -jnp.inf)
        l_ref[...] = jnp.zeros_like(l_ref)
        acc_ref[...] = jnp.zeros_like(acc_ref)
        # Pre-slice per-head q once per (batch, q-tile); the q block stays
        # resident across the whole KV axis so the lane extraction happens once.
        for h in range(heads):
            lo = h * dim_head
            q_sc[h] = q_ref[0, :, lo:lo + dim_head]

    # Per-head online-softmax update; heads are packed along lanes of the
    # (1, tile, heads*dim_head) blocks.  The softmax scale is already folded
    # into the q-projection weights.
    for h in range(heads):
        lo = h * dim_head
        kh = k_ref[0, :, lo:lo + dim_head]                    # (tk, dh), native dtype
        vh = v_ref[0, :, lo:lo + dim_head]                    # (tk, dh), native dtype
        s = lax.dot_general(q_sc[h], kh, nt_dims,
                            preferred_element_type=jnp.float32)   # (tq, tk) f32, no transpose
        if kv_valid is not None:                              # mask zero-padded KV rows
            col = ki * kv_tile + lax.broadcasted_iota(jnp.int32, s.shape, 1)
            s = jnp.where(col < kv_valid, s, -1e30)
        m_prev = m_ref[h]                                     # (tq, 1)
        m_new = jnp.maximum(m_prev, jnp.max(s, axis=-1, keepdims=True))
        alpha = jnp.exp(m_prev - m_new)
        p = jnp.exp(s - m_new)                                # (tq, tk) f32
        l_ref[h] = alpha * l_ref[h] + jnp.sum(p, axis=-1, keepdims=True)
        acc_ref[:, lo:lo + dim_head] = (
            alpha * acc_ref[:, lo:lo + dim_head]
            + jnp.dot(p.astype(vh.dtype), vh, preferred_element_type=jnp.float32))
        m_ref[h] = m_new

    @pl.when(ki == pl.num_programs(2) - 1)
    def _():
        # Normalize in place, then fuse the to_out projection (+ bias): the
        # (B, Nq, inner) activation never hits HBM and the store is a single
        # lane-dense (tq, query_dim) write.
        for h in range(heads):
            lo = h * dim_head
            inv_l = pl.reciprocal(l_ref[h], approx=True)      # EUP slot
            acc_ref[:, lo:lo + dim_head] = acc_ref[:, lo:lo + dim_head] * inv_l
        attn = acc_ref[...].astype(wo_ref.dtype)              # (tq, inner)
        y = jnp.dot(attn, wo_ref[...], preferred_element_type=jnp.float32)
        o_ref[0] = (y + bo_ref[...].astype(jnp.float32)).astype(o_ref.dtype)


def pallas_flash_attention_out(q, k, v, wo_t, bias, *, heads, dim_head,
                               q_blk=0, k_blk=0, v_blk=0, tq=None, tk=None):
    """q: (B, Nq, *), k/v: (B, Nk, *) with head channels packed last.

    `*_blk` pick which inner_dim-wide channel block of each array holds q/k/v,
    so fused QKV / KV projection outputs are consumed in place (no splits, no
    head transposes).  Output is the projected (B, Nq, query_dim) tensor.
    """
    b, nq = q.shape[0], q.shape[1]
    nk = k.shape[1]
    inner = heads * dim_head
    qdim = wo_t.shape[1]
    tq0, tk0 = _attn_tile_defaults()
    tq = _fit_sub_tile(nq, tq or tq0)
    tk = _fit_sub_tile(nk, tk or tk0)

    # Ragged tails: zero-pad to tile multiples.  Padded q rows are sliced off;
    # padded kv rows are masked to -inf in-kernel via kv_valid.
    nq_p, nk_p = _round_up(nq, tq), _round_up(nk, tk)
    if nq_p != nq:
        q = jnp.pad(q, ((0, 0), (0, nq_p - nq), (0, 0)))
    if nk_p != nk:
        same_kv = v is k
        k = jnp.pad(k, ((0, 0), (0, nk_p - nk), (0, 0)))
        v = k if same_kv else jnp.pad(v, ((0, 0), (0, nk_p - nk), (0, 0)))
    kv_valid = nk if nk_p != nk else None

    bo2d = bias.reshape(1, qdim)
    kernel = functools.partial(_flash_attn_out_kernel, heads=heads,
                               dim_head=dim_head, kv_tile=tk, kv_valid=kv_valid)
    grid = (b, nq_p // tq, nk_p // tk)
    out = pl.pallas_call(
        kernel,
        out_shape=jax.ShapeDtypeStruct((b, nq_p, qdim), q.dtype),
        grid=grid,
        in_specs=[
            pl.BlockSpec((1, tq, inner), lambda bb, qi, ki: (bb, qi, q_blk)),
            pl.BlockSpec((1, tk, inner), lambda bb, qi, ki: (bb, ki, k_blk)),
            pl.BlockSpec((1, tk, inner), lambda bb, qi, ki: (bb, ki, v_blk)),
            pl.BlockSpec((inner, qdim), lambda bb, qi, ki: (0, 0)),   # VMEM-resident weight
            pl.BlockSpec((1, qdim), lambda bb, qi, ki: (0, 0)),       # VMEM-resident bias
        ],
        out_specs=pl.BlockSpec((1, tq, qdim), lambda bb, qi, ki: (bb, qi, 0)),
        scratch_shapes=[
            pltpu.VMEM((heads, tq, dim_head), q.dtype),   # pre-sliced per-head q
            pltpu.VMEM((heads, tq, 1), jnp.float32),      # running max
            pltpu.VMEM((heads, tq, 1), jnp.float32),      # running denominator
            pltpu.VMEM((tq, inner), jnp.float32),         # running output (lane-packed)
        ],
        compiler_params=pltpu.CompilerParams(
            dimension_semantics=("parallel", "parallel", "arbitrary"),
            vmem_limit_bytes=_VMEM_LIMIT),
    )(q, k, v, wo_t, bo2d)
    return out[:, :nq] if nq_p != nq else out


# ----------------------------------------------------------------------------
# Module (forward only, default branches)
# ----------------------------------------------------------------------------
class MemoryEfficientCrossAttentionPallas:
    def __init__(self, query_dim, context_dim=None, heads=8, dim_head=64,
                 dtype=jnp.float32, key=None):
        context_dim = query_dim if context_dim is None else context_dim
        self.heads = heads
        self.dim_head = dim_head
        inner = heads * dim_head
        key = jax.random.PRNGKey(0) if key is None else key
        kq, kk, kv, ko, kb = jax.random.split(key, 5)
        sq = 1.0 / math.sqrt(query_dim)
        sc = 1.0 / math.sqrt(context_dim)
        si = 1.0 / math.sqrt(inner)
        # PyTorch Linear stores W:(out,in); we keep the transposed (in,out) form.
        self.wq_t = (jax.random.normal(kq, (query_dim, inner), jnp.float32) * sq).astype(dtype)
        self.wk_t = (jax.random.normal(kk, (context_dim, inner), jnp.float32) * sc).astype(dtype)
        self.wv_t = (jax.random.normal(kv, (context_dim, inner), jnp.float32) * sc).astype(dtype)
        self.wo_t = (jax.random.normal(ko, (inner, query_dim), jnp.float32) * si).astype(dtype)
        self.bo = (jax.random.normal(kb, (query_dim,), jnp.float32) * si).astype(dtype)
        # Kernel-side derived weights: the softmax scale (1/sqrt(dim_head)) is
        # folded into the q columns; k/v (and q for self-attn) share one GEMM.
        scale = jnp.float32(1.0 / math.sqrt(dim_head))
        self._wq_s = (self.wq_t.astype(jnp.float32) * scale).astype(dtype)
        self._wkv = jnp.concatenate([self.wk_t, self.wv_t], axis=1)
        self._wqkv_s = (jnp.concatenate([self._wq_s, self.wk_t, self.wv_t], axis=1)
                        if context_dim == query_dim else None)

    # TODO(synk): add_lora / action_control / additional_tokens / causal
    # attn_bias / n_times_crossframe_attn_in_self branches are not built
    # (module defaults only); dropout is an inference no-op.
    def __call__(self, x, context=None):
        b, nq, _ = x.shape
        h, dh = self.heads, self.dim_head
        inner = h * dh
        x2d = x.reshape(b * nq, -1)
        # Channel-block slicing of a fused projection output needs inner % 128 == 0
        # (sub-full-dim lane blocks must be 128-aligned).
        fused_ok = (inner % 128) == 0

        if context is None and self._wqkv_s is not None and fused_ok:
            # self-attention: one fused (pre-scaled) QKV GEMM, consumed in place.
            qkv = pallas_linear(x2d, self._wqkv_s).reshape(b, nq, 3 * inner)
            return pallas_flash_attention_out(
                qkv, qkv, qkv, self.wo_t, self.bo, heads=h, dim_head=dh,
                q_blk=0, k_blk=1, v_blk=2)

        ctx = x if context is None else context
        nk = ctx.shape[1]
        c2d = ctx.reshape(b * nk, -1)
        q = pallas_linear(x2d, self._wq_s).reshape(b, nq, inner)
        if fused_ok:
            # cross-attention: fused KV GEMM over context, consumed in place.
            kv = pallas_linear(c2d, self._wkv).reshape(b, nk, 2 * inner)
            return pallas_flash_attention_out(
                q, kv, kv, self.wo_t, self.bo, heads=h, dim_head=dh,
                q_blk=0, k_blk=0, v_blk=1)
        k = pallas_linear(c2d, self.wk_t).reshape(b, nk, inner)
        v = pallas_linear(c2d, self.wv_t).reshape(b, nk, inner)
        return pallas_flash_attention_out(
            q, k, v, self.wo_t, self.bo, heads=h, dim_head=dh)


# ----------------------------------------------------------------------------
# pure-JAX reference (PyTorch-equivalent semantics, f32 math)
# ----------------------------------------------------------------------------
def _reference_forward(mod, x, context=None):
    ctx = x if context is None else context
    b, nq, _ = x.shape
    nk = ctx.shape[1]
    h, dh = mod.heads, mod.dim_head
    f32 = jnp.float32
    q = (x.reshape(b * nq, -1).astype(f32) @ mod.wq_t.astype(f32)).reshape(b, nq, h, dh)
    k = (ctx.reshape(b * nk, -1).astype(f32) @ mod.wk_t.astype(f32)).reshape(b, nk, h, dh)
    v = (ctx.reshape(b * nk, -1).astype(f32) @ mod.wv_t.astype(f32)).reshape(b, nk, h, dh)
    s = jnp.einsum("bqhd,bkhd->bhqk", q, k) / math.sqrt(dh)
    p = jax.nn.softmax(s, axis=-1)
    o = jnp.einsum("bhqk,bkhd->bqhd", p, v).reshape(b * nq, h * dh)
    y = o @ mod.wo_t.astype(f32) + mod.bo.astype(f32)
    return y.reshape(b, nq, -1)


# ----------------------------------------------------------------------------
if __name__ == "__main__":
    key = jax.random.PRNGKey(0)
    k_x, k_ctx, k_params, k_q, k_k, k_v, k_w, k_b = jax.random.split(key, 8)

    # Small shapes; heads*dim_head = 128 so the fused-QKV / fused-KV channel-block
    # paths are exercised.
    B, NQ, NK, QUERY_DIM = 2, 16, 8, 32
    HEADS, DIM_HEAD = 4, 32

    x = jax.random.normal(k_x, (B, NQ, QUERY_DIM), jnp.float32)
    ctx = jax.random.normal(k_ctx, (B, NK, QUERY_DIM), jnp.float32)

    mod = MemoryEfficientCrossAttentionPallas(
        query_dim=QUERY_DIM, heads=HEADS, dim_head=DIM_HEAD, key=k_params)

    out_self = jax.block_until_ready(mod(x))          # fused-QKV self-attention path
    out_cross = jax.block_until_ready(mod(x, ctx))    # q + fused-KV cross-attention path
    assert out_self.shape == (B, NQ, QUERY_DIM), out_self.shape
    assert out_cross.shape == (B, NQ, QUERY_DIM), out_cross.shape
    assert bool(jnp.allclose(out_self, _reference_forward(mod, x), rtol=2e-2, atol=2e-2))
    assert bool(jnp.allclose(out_cross, _reference_forward(mod, x, ctx), rtol=2e-2, atol=2e-2))

    # bf16 module (MXU-friendly precision; f32 accumulation inside the kernels).
    mod16 = MemoryEfficientCrossAttentionPallas(
        query_dim=QUERY_DIM, heads=HEADS, dim_head=DIM_HEAD,
        dtype=jnp.bfloat16, key=k_params)
    x16 = x.astype(jnp.bfloat16)
    out16 = jax.block_until_ready(mod16(x16))
    assert out16.shape == (B, NQ, QUERY_DIM)
    assert bool(jnp.all(jnp.isfinite(out16.astype(jnp.float32))))
    assert bool(jnp.allclose(out16.astype(jnp.float32),
                             _reference_forward(mod16, x16), rtol=1e-1, atol=1e-1))

    # Ragged-KV masking path: non-divisible Nk with small explicit tiles
    # (Nk=40, tk=16 -> padded to 48, last tile masked).
    NKR = 40
    INNER = HEADS * DIM_HEAD
    qh = jax.random.normal(k_q, (1, NQ, INNER), jnp.float32) / math.sqrt(DIM_HEAD)
    kh = jax.random.normal(k_k, (1, NKR, INNER), jnp.float32)
    vh = jax.random.normal(k_v, (1, NKR, INNER), jnp.float32)
    wo = jax.random.normal(k_w, (INNER, QUERY_DIM), jnp.float32) * 0.1
    bo = jax.random.normal(k_b, (QUERY_DIM,), jnp.float32) * 0.1
    out_m = jax.block_until_ready(pallas_flash_attention_out(
        qh, kh, vh, wo, bo, heads=HEADS, dim_head=DIM_HEAD, tq=8, tk=16))
    qr = qh.reshape(1, NQ, HEADS, DIM_HEAD)
    kr = kh.reshape(1, NKR, HEADS, DIM_HEAD)
    vr = vh.reshape(1, NKR, HEADS, DIM_HEAD)
    pr = jax.nn.softmax(jnp.einsum("bqhd,bkhd->bhqk", qr, kr), axis=-1)
    ref_m = jnp.einsum("bhqk,bkhd->bqhd", pr, vr).reshape(1, NQ, INNER) @ wo + bo
    assert out_m.shape == (1, NQ, QUERY_DIM)
    assert bool(jnp.allclose(out_m, ref_m, rtol=2e-2, atol=2e-2))

    print("KERNEL_OK")
</pallas_src>

<mosaic_0001>
module attributes {stable_mosaic.version = 11 : i64} {
  func.func @_matmul_kernel(%arg0: i32, %arg1: i32, %arg2: i32, %arg3: memref<32x32xf32, #tpu.memory_space<vmem>>, %arg4: memref<32x384xf32, #tpu.memory_space<vmem>>, %arg5: memref<32x384xf32, #tpu.memory_space<vmem>>, %arg6: memref<32x384xf32, #tpu.memory_space<vmem>>) attributes {dimension_semantics = [#tpu.dimension_semantics<parallel>, #tpu.dimension_semantics<parallel>, #tpu.dimension_semantics<arbitrary>], iteration_bounds = array<i64: 1, 1, 1>, scalar_prefetch = 0 : i64, scratch_operands = 1 : i64, tpu.core_type = #tpu.core_type<tc>, window_params = [{transform_indices = @transform_0, window_bounds = array<i64: 32, 32>}, {transform_indices = @transform_1, window_bounds = array<i64: 32, 384>}, {transform_indices = @transform_2, window_bounds = array<i64: 32, 384>}]} {
    %c0_i32 = arith.constant 0 : i32
    %0 = arith.cmpi eq, %arg2, %c0_i32 : i32
    %1 = arith.extui %0 : i1 to i32
    %c0_i32_0 = arith.constant 0 : i32
    %2 = arith.cmpi ne, %1, %c0_i32_0 : i32
    scf.if %2 {
      %cst_10 = arith.constant 0.000000e+00 : f32
      %12 = vector.broadcast %cst_10 : f32 to vector<32x384xf32>
      %c0_11 = arith.constant 0 : index
      %c0_12 = arith.constant 0 : index
      %13 = vector.load %arg6[%c0_11, %c0_12] : memref<32x384xf32, #tpu.memory_space<vmem>>, vector<32x384xf32>
      tpu.vector_store %arg6[%c0_11, %c0_12], %12 {strides = array<i32>} : memref<32x384xf32, #tpu.memory_space<vmem>>, vector<32x384xf32>,
    } else {
    }
    %c0 = arith.constant 0 : index
    %c0_1 = arith.constant 0 : index
    %3 = vector.load %arg6[%c0, %c0_1] : memref<32x384xf32, #tpu.memory_space<vmem>>, vector<32x384xf32>
    %c0_2 = arith.constant 0 : index
    %c0_3 = arith.constant 0 : index
    %4 = vector.load %arg3[%c0_2, %c0_3] : memref<32x32xf32, #tpu.memory_space<vmem>>, vector<32x32xf32>
    %c0_4 = arith.constant 0 : index
    %c0_5 = arith.constant 0 : index
    %5 = vector.load %arg4[%c0_4, %c0_5] : memref<32x384xf32, #tpu.memory_space<vmem>>, vector<32x384xf32>
    %cst = arith.constant dense<0.000000e+00> : vector<32x384xf32>
    %6 = tpu.matmul %4, %5, %cst {dimension_numbers = #tpu.dot_dimension_numbers<[1], [0], [0], [1], [0, 0, 1, 1], [], []>} : vector<32x32xf32>, vector<32x384xf32>, vector<32x384xf32> -> vector<32x384xf32>
    %7 = arith.addf %3, %6 : vector<32x384xf32>
    %c0_6 = arith.constant 0 : index
    %c0_7 = arith.constant 0 : index
    %8 = vector.load %arg6[%c0_6, %c0_7] : memref<32x384xf32, #tpu.memory_space<vmem>>, vector<32x384xf32>
    tpu.vector_store %arg6[%c0_6, %c0_7], %7 {strides = array<i32>} : memref<32x384xf32, #tpu.memory_space<vmem>>, vector<32x384xf32>,
    %c0_i32_8 = arith.constant 0 : i32
    %9 = arith.cmpi eq, %arg2, %c0_i32_8 : i32
    %10 = arith.extui %9 : i1 to i32
    %c0_i32_9 = arith.constant 0 : i32
    %11 = arith.cmpi ne, %10, %c0_i32_9 : i32
    scf.if %11 {
      %c0_10 = arith.constant 0 : index
      %c0_11 = arith.constant 0 : index
      %12 = vector.load %arg6[%c0_10, %c0_11] : memref<32x384xf32, #tpu.memory_space<vmem>>, vector<32x384xf32>
      %c0_12 = arith.constant 0 : index
      %c0_13 = arith.constant 0 : index
      %13 = vector.load %arg5[%c0_12, %c0_13] : memref<32x384xf32, #tpu.memory_space<vmem>>, vector<32x384xf32>
      tpu.vector_store %arg5[%c0_12, %c0_13], %12 {strides = array<i32>} : memref<32x384xf32, #tpu.memory_space<vmem>>, vector<32x384xf32>,
    } else {
    }
    return
  }
  func.func @transform_0(%arg0: i32, %arg1: i32, %arg2: i32) -> (i32, i32) {
    %c0_i32 = arith.constant 0 : i32
    return %arg0, %arg2 : i32, i32
  }
  func.func @transform_1(%arg0: i32, %arg1: i32, %arg2: i32) -> (i32, i32) {
    %c0_i32 = arith.constant 0 : i32
    return %arg2, %arg1 : i32, i32
  }
  func.func @transform_2(%arg0: i32, %arg1: i32, %arg2: i32) -> (i32, i32) {
    %c0_i32 = arith.constant 0 : i32
    return %arg0, %arg1 : i32, i32
  }
}

</mosaic_0001>

<bundles_post_ra>
// kernel: tpu_custom_call.1
= control target key start
LH: loop header
LB: loop body
LE: loop exit
PB: predicated region body
PF: predicated region fallthrough
CT: control target
= control target key end

     0   :  { %7 = vsyncpa [#allocation4], 0  ;;  %s539_s0 = inlined_call_operand.hbm [shape: f32[32,32], index: 0, kind: input, shape index: {}]   ;;  %s540_s1 = inlined_call_operand.hbm [shape: f32[32,384], index: 1, kind: input, shape index: {}]   ;;  %s541_s2 = inlined_call_operand.hbm [shape: f32[32,384], index: 2, kind: output, shape index: {}]  }
   0x1   :  { %8 = vsyncpa [#allocation7], 0 }
   0x2   :  { %9 = vsyncpa [#allocation5], 0  ;;  %s466_s9 = smov [#allocation3]   ;;  %s394_s13 = scalar_lea.hbm %s539_s0, 512 }
   0x3   :  { %s15_s10 = sshll.u32 %s466_s9, 4  ;;  %p395_p0 = scmp.ne.s32.totalorder %s539_s0, %s394_s13  ;;  %s16_s10 = int_to_ptr.vmem [resolvable:$true] %s15_s10 }
   0x4   :  { %p398_p1 = scmp.lt.u32.totalorder %s394_s13, %s539_s0 }
   0x6   :  { %p400_p2 = pnand %p398_p1, %p395_p0 }
   0x8   :  { %403 = shalt.err (!%p400_p2)
}
   0x9   :  { %s404_s18 = scalar_lea.vmem %s16_s10, 512  ;;  %p409_p4 = scmp.lt.s32.totalorder %s16_s10, %s16_s10 }
   0xa   :  { %p405_p3 = scmp.ne.s32.totalorder %s16_s10, %s404_s18  ;;  %p410_p5 = scmp.lt.s32.totalorder %s404_s18, %s404_s18 }
   0xc   :  { %p411_p6 = por %p410_p5, %p409_p4 }
   0xe   :  { %p412_p7 = pnand %p411_p6, %p405_p3 }
  0x10   :  { %415 = shalt.err (!%p412_p7)
}
  0x11   :  { %s467_s19 = smov 128   ;;  %s468_s20 = smov 8  }
  0x12   :  { %21 = dma.hbm_to_vmem [thread:$0]  %s539_s0, 512, %s16_s10, [#allocation4], %s467_s19, %s467_s19, %s468_s20  }
  0x13   :  { %s469_s23 = smov [#allocation6]   ;;  %s416_s27 = scalar_lea.hbm %s540_s1, 1536 }
  0x14   :  { %s27_s24 = sshll.u32 %s469_s23, 4  ;;  %p417_p8 = scmp.ne.s32.totalorder %s540_s1, %s416_s27  ;;  %s28_s24 = int_to_ptr.vmem [resolvable:$true] %s27_s24 }
  0x15   :  { %p420_p9 = scmp.lt.u32.totalorder %s416_s27, %s540_s1 }
  0x17   :  { %p422_p10 = pnand %p420_p9, %p417_p8 }
  0x19   :  { %425 = shalt.err (!%p422_p10)
}
  0x1a   :  { %s426_s4 = scalar_lea.vmem %s28_s24, 1536  ;;  %p431_p12 = scmp.lt.s32.totalorder %s28_s24, %s28_s24 }
  0x1b   :  { %p427_p11 = scmp.ne.s32.totalorder %s28_s24, %s426_s4  ;;  %p432_p13 = scmp.lt.s32.totalorder %s426_s4, %s426_s4 }
  0x1d   :  { %p433_p0 = por %p432_p13, %p431_p12 }
  0x1f   :  { %p434_p1 = pnand %p433_p0, %p427_p11 }
  0x21   :  { %437 = shalt.err (!%p434_p1)
}
  0x22   :  { %s470_s0 = smov 384   ;;  %s471_s5 = smov 24  }
  0x23   :  { %33 = dma.hbm_to_vmem [thread:$0]  %s540_s1, 1536, %s28_s24, [#allocation7], %s470_s0, %s470_s0, %s471_s5  }
  0x24   :  { %460 = dma.done.wait [#allocation4], 512  }
  0x25   :  { %461 = vsyncadd [#allocation4], 4294966784 }
  0x26   :  { %462 = dma.done.wait [#allocation7], 1536  }
  0x27   :  { %463 = vsyncadd [#allocation7], 4294965760  ;;  %v472_v0 = vmov 0.0   ;;  %v73_v1 = vld [vmem:[#allocation6 + $0x8] sm:$0xff]  ;;  %v76_v2 = vld [vmem:[#allocation6 + $0x20] sm:$0xff]  ;;  %vm84_vm0 = vcmask 261120  }
  0x28   :  { %161 = vmatprep.mubr.f32.mxu0 %v472_v0  ;;  %v72_v3 = vld [vmem:[#allocation6] sm:$0xff]  ;;  %v370_v4 = vpack.c.bf16 %v76_v2, %v73_v1  ;;  %v75_v5 = vld [vmem:[#allocation6 + $0x18] sm:$0xff]  ;;  %v82_v7 = vld [vmem:[#allocation6 + $0x50] sm:$0xff]  ;;  %s473_s1 = smov [#allocation8]  }
  0x29   :  { %v79_v6 = vld [vmem:[#allocation6 + $0x38] sm:$0xff]  ;;  %v372_v8 = vpack.c.bf16 %v75_v5, %v72_v3  ;;  %v78_v10 = vld [vmem:[#allocation6 + $0x30] sm:$0xff]  ;;  %v81_v11 = vld [vmem:[#allocation6 + $0x48] sm:$0xff]  ;;  %s327_s8 = sshll.u32 %s473_s1, 4  ;;  %s328_s8 = int_to_ptr.vmem [resolvable:$true] %s327_s8 }
  0x2a   :  { %v374_v9 = vpack.c.bf16 %v82_v7, %v79_v6  ;;  %v74_v12 = vld [vmem:[#allocation6 + $0x10] sm:$0xff]  ;;  %371 = vmatprep.subr.bf16.mxu0 %v370_v4  ;;  %v77_v13 = vld [vmem:[#allocation6 + $0x28] sm:$0xff]  ;;  %v68_v14 = vld [vmem:[#allocation3] sm:$0xff]  ;;  %v376_v16 = vpack.c.bf16 %v81_v11, %v78_v10  ;;  %s438_s9 = scalar_lea.vmem %s328_s8, 1536  ;;  %p443_p3 = scmp.lt.s32.totalorder %s328_s8, %s328_s8 }
  0x2b   :  { %v80_v15 = vld [vmem:[#allocation6 + $0x40] sm:$0xff]  ;;  %373 = vmatpush1.bf16.msra.mxu0 %v372_v8  ;;  %v378_v17 = vpack.c.bf16 %v77_v13, %v74_v12  ;;  %v83_v18 = vld [vmem:[#allocation6 + $0x58] sm:$0xff]  ;;  %364 = vmatprep.mubr.msk.f32.mxu1 %vm84_vm0, %v68_v14  ;;  %v69_v20 = vld [vmem:[#allocation3 + $0x8] sm:$0xff]  ;;  %p439_p2 = scmp.ne.s32.totalorder %s328_s8, %s438_s9  ;;  %p444_p4 = scmp.lt.s32.totalorder %s438_s9, %s438_s9 }
  0x2c   :  { %375 = vmatprep.subr.bf16.mxu0 %v374_v9  ;;  %v382_v19 = vpack.c.bf16 %v83_v18, %v80_v15  ;;  %v70_v21 = vld [vmem:[#allocation3 + $0x10] sm:$0xff]  ;;  %v71_v22 = vld [vmem:[#allocation3 + $0x18] sm:$0xff] }
  0x2d   :  { %379 = vmatprep.subr.bf16.mxu1 %v378_v17  ;;  %p445_p5 = por %p444_p4, %p443_p3 }
  0x2e   :  { %381 = vmatpush3.bf16.msra.mxu1 %v378_v17 }
  0x2f   :  { %377 = vmatpush1.bf16.msra.mxu0 %v376_v16  ;;  %383 = vmatprep.subr.bf16.mxu1 %v382_v19  ;;  %p446_p6 = pnand %p445_p5, %p439_p2 }
  0x32   :  { %340 = vmatmul.mubr.msk.f32.vlgmr.msra.gmra.mrb[0].mxu0 %vm84_vm0, %v68_v14  ;;  %385 = vmatpush3.bf16.msra.mxu1 %v382_v19 }
  0x33   :  { %167 = vmatprep.mubr.f32.mxu0 %v472_v0 }
  0x35   :  { %365 = vmatmul.mubr.msk.f32.vlgmr.msra.gmra.mrb[0].mxu1 %vm84_vm0, %v69_v20 }
  0x36   :  { %341 = vmatmul.mubr.msk.f32.gmra.mrb[2].mxu0 %vm84_vm0, %v69_v20  ;;  %367 = vmatprep.mubr.msk.f32.mxu1 %vm84_vm0, %v70_v21 }
  0x37   :  { %173 = vmatprep.mubr.f32.mxu0 %v472_v0 }
  0x39   :  { %368 = vmatmul.mubr.msk.f32.gmra.mrb[2].mxu1 %vm84_vm0, %v71_v22 }
  0x3a   :  { %342 = vmatmul.mubr.msk.f32.gmra.mrb[4].mxu0 %vm84_vm0, %v70_v21 }
  0x3b   :  { %179 = vmatprep.mubr.f32.mxu0 %v472_v0 }
  0x3e   :  { %343 = vmatmul.mubr.msk.f32.gmra.mrb[6].mxu0 %vm84_vm0, %v71_v22 }
 0x105   :  { %v163_v23 = vpop.f32.mrb[0].mxu0 }
 0x106   :  { %310 = vst [vmem:[#allocation8] sm:$0xff] %v163_v23  ;;  %v165_v24 = vpop.f32.mrb[1].mxu0 }
 0x107   :  { %311 = vst [vmem:[#allocation8 + $0x8] sm:$0xff] %v165_v24 }
 0x108   :  { %v366_v25 = vpop.f32.mrb[0].mxu1 }
 0x109   :  { %v169_v26 = vpop.f32.mrb[2].mxu0  ;;  %315 = vst [vmem:[#allocation8 + $0x28] sm:$0xff] %v366_v25  ;;  %v252_v27 = vpop.f32.mrb[1].mxu1 }
 0x10a   :  { %313 = vst [vmem:[#allocation8 + $0x18] sm:$0xff] %v169_v26  ;;  %v171_v28 = vpop.f32.mrb[3].mxu0  ;;  %312 = vst [vmem:[#allocation8 + $0x10] sm:$0xff] %v252_v27 }
 0x10b   :  { %314 = vst [vmem:[#allocation8 + $0x20] sm:$0xff] %v171_v28 }
 0x10c   :  { %v369_v29 = vpop.f32.mrb[2].mxu1 }
 0x10d   :  { %v175_v30 = vpop.f32.mrb[4].mxu0  ;;  %321 = vst [vmem:[#allocation8 + $0x58] sm:$0xff] %v369_v29  ;;  %v262_v31 = vpop.f32.mrb[3].mxu1 }
 0x10e   :  { %316 = vst [vmem:[#allocation8 + $0x30] sm:$0xff] %v175_v30  ;;  %v177_v32 = vpop.f32.mrb[5].mxu0  ;;  %318 = vst [vmem:[#allocation8 + $0x40] sm:$0xff] %v262_v31 }
 0x10f   :  { %317 = vst [vmem:[#allocation8 + $0x38] sm:$0xff] %v177_v32 }
 0x111   :  { %v181_v33 = vpop.f32.mrb[6].mxu0 }
 0x112   :  { %319 = vst [vmem:[#allocation8 + $0x48] sm:$0xff] %v181_v33  ;;  %v183_v34 = vpop.f32.mrb[7].mxu0 }
 0x113   :  { %320 = vst [vmem:[#allocation8 + $0x50] sm:$0xff] %v183_v34 }
 0x114   :  { %449 = shalt.err (!%p446_p6)
}
 0x115   :  { %s450_s12 = scalar_lea.hbm %s541_s2, 1536 }
 0x116   :  { %p451_p7 = scmp.ne.s32.totalorder %s541_s2, %s450_s12  ;;  %p454_p8 = scmp.lt.u32.totalorder %s450_s12, %s541_s2 }
 0x118   :  { %p456_p9 = pnand %p454_p8, %p451_p7 }
 0x11a   :  { %459 = shalt.err (!%p456_p9)
}
 0x11b   :  { %333 = dma.vmem_to_hbm [thread:$0]  %s328_s8, 1536, %s541_s2, [#allocation5], %s470_s0, %s470_s0, %s471_s5  }
 0x11c   :  { %464 = dma.done.wait [#allocation5], 1536  }
 0x11d   :  { %465 = vsyncadd [#allocation5], 4294965760 }
 0x11e   :  { %337 = vsyncpa [#allocation4], 1 }
 0x11f   :  { %338 = vsyncpa [#allocation7], 1 }
 0x120   :  { %339 = vsyncpa [#allocation5], 1 }

</bundles_post_ra>
